<compile_context>
chip_gen: v5e
topology: v5e:2x2
jax: 0.10.0
libtpu: 0.0.40
codegen_flags: <defaults>
</compile_context>

<pallas_src>
import jax
import jax.numpy as jnp
from jax.experimental import pallas as pl
from jax.experimental.pallas import tpu as pltpu

_LANE = 128
_SUBLANE = 8


def _round_up(n, m):
    return ((n + m - 1) // m) * m


def _fused_mlp_kernel(x_ref, wh_ref, sh_ref, w4_ref, s4_ref, o_ref):
    """Fused 4-layer MLP (eval-mode).

    x_ref : (TB, H)        f32   input rows for this grid step
    wh_ref: (3, H, H)      bf16  folded hidden weights (BN scale pre-multiplied into columns)
    sh_ref: (3, H)         f32   folded hidden shifts (bias + BN)
    w4_ref: (H, OUT_PAD)   bf16  folded output weight, zero-padded to a lane-dense width
    s4_ref: (1, OUT_PAD)   f32   folded output shift, zero-padded
    o_ref : (TB, OUT_PAD)  f32   lane-dense output
    """
    h = x_ref[...].astype(jnp.bfloat16)
    for i in range(3):                                    # static unroll: 3 hidden layers
        y = jnp.dot(h, wh_ref[i], preferred_element_type=jnp.float32)
        y = jnp.maximum(y + sh_ref[i:i + 1, :], 0.0)      # shift + ReLU in f32
        h = y.astype(jnp.bfloat16)
    y = jnp.dot(h, w4_ref[...], preferred_element_type=jnp.float32)
    o_ref[...] = y + s4_ref[...]                          # unmasked full-lane store


def make_params(num_inputs, num_outputs, key, eps=1e-5):
    """PyTorch-like init (Linear U(-1/sqrt(fin), 1/sqrt(fin)); BN gamma=1, beta=0, mean=0, var=1),
    with Linear bias + eval-mode BatchNorm folded into the weights (fold in f32, then cast bf16)."""
    dims = [(num_inputs, num_inputs)] * 3 + [(num_inputs, num_outputs)]
    w_folds, shifts = [], []
    for i, (fin, fout) in enumerate(dims):
        kw, kb = jax.random.split(jax.random.fold_in(key, i))
        bound = 1.0 / (fin ** 0.5)
        w = jax.random.uniform(kw, (fout, fin), jnp.float32, -bound, bound)   # PyTorch (out, in)
        b = jax.random.uniform(kb, (fout,), jnp.float32, -bound, bound)
        gamma = jnp.ones((fout,), jnp.float32)
        beta = jnp.zeros((fout,), jnp.float32)
        rmean = jnp.zeros((fout,), jnp.float32)
        rvar = jnp.ones((fout,), jnp.float32)
        scale = gamma / jnp.sqrt(rvar + eps)                  # (out,)
        shift = b * scale + beta - rmean * scale              # (out,)
        w_folds.append(w.T * scale[None, :])                  # (in, out), scale folded in f32
        shifts.append(shift)

    H = num_inputs
    out_pad = max(_LANE, _round_up(num_outputs, _LANE))
    wh = jnp.stack(w_folds[:3]).astype(jnp.bfloat16)          # (3, H, H)  bf16
    sh = jnp.stack(shifts[:3])                                # (3, H)     f32
    w4 = jnp.zeros((H, out_pad), jnp.float32).at[:, :num_outputs].set(w_folds[3])
    w4 = w4.astype(jnp.bfloat16)                              # (H, OUT_PAD) bf16
    s4 = jnp.zeros((1, out_pad), jnp.float32).at[0, :num_outputs].set(shifts[3])
    return {"wh": wh, "sh": sh, "w4": w4, "s4": s4, "num_outputs": num_outputs}


def model_forward(x, p):
    B, H = x.shape
    out_pad = p["s4"].shape[1]

    # Unified grid path: sublane-align the batch, <=128 rows per grid step.
    tb = _LANE if B >= _LANE else _round_up(max(B, 1), _SUBLANE)
    pB = _round_up(B, tb)
    xp = jnp.pad(x, ((0, pB - B), (0, 0))) if pB != B else x
    grid = (pB // tb,)

    flops = 2 * pB * (3 * H * H + H * out_pad)
    bytes_accessed = (xp.size * 4 + p["wh"].size * 2 + p["sh"].size * 4
                      + p["w4"].size * 2 + p["s4"].size * 4 + pB * out_pad * 4)
    cost = pl.CostEstimate(flops=flops, transcendentals=0, bytes_accessed=bytes_accessed)

    out = pl.pallas_call(
        _fused_mlp_kernel,
        out_shape=jax.ShapeDtypeStruct((pB, out_pad), jnp.float32),
        grid=grid,
        in_specs=[
            pl.BlockSpec((tb, H), lambda i: (i, 0)),
            pl.BlockSpec(p["wh"].shape, lambda i: (0, 0, 0)),
            pl.BlockSpec(p["sh"].shape, lambda i: (0, 0)),
            pl.BlockSpec(p["w4"].shape, lambda i: (0, 0)),
            pl.BlockSpec(p["s4"].shape, lambda i: (0, 0)),
        ],
        out_specs=pl.BlockSpec((tb, out_pad), lambda i: (i, 0)),
        cost_estimate=cost,
        compiler_params=pltpu.CompilerParams(dimension_semantics=("parallel",)),
    )(xp, p["wh"], p["sh"], p["w4"], p["s4"])

    return out[:B, :p["num_outputs"]]


def _reference_forward(x, p):
    """Pure-JAX reference using the same folded (bf16-rounded) parameters."""
    h = x
    for i in range(3):
        h = jnp.maximum(h @ p["wh"][i].astype(jnp.float32) + p["sh"][i], 0.0)
    y = h @ p["w4"].astype(jnp.float32) + p["s4"][0]
    return y[:, :p["num_outputs"]]


if __name__ == "__main__":
    num_inputs, num_outputs, batch = 32, 16, 8

    key = jax.random.PRNGKey(0)
    kx, kp = jax.random.split(key)
    x = jax.random.normal(kx, (batch, num_inputs), jnp.float32)
    params = make_params(num_inputs, num_outputs, kp)

    out = jax.block_until_ready(model_forward(x, params))
    ref = _reference_forward(x, params)

    assert out.shape == (batch, num_outputs)
    assert jnp.allclose(out, ref, atol=2e-3, rtol=2e-3), "mismatch vs JAX reference"

    print("KERNEL_OK")
</pallas_src>

<mosaic_0001>
module attributes {stable_mosaic.version = 11 : i64} {
  func.func @_fused_mlp_kernel(%arg0: i32, %arg1: memref<8x32xf32, #tpu.memory_space<vmem>>, %arg2: memref<3x32x32xbf16, #tpu.memory_space<vmem>>, %arg3: memref<3x32xf32, #tpu.memory_space<vmem>>, %arg4: memref<32x128xbf16, #tpu.memory_space<vmem>>, %arg5: memref<1x128xf32, #tpu.memory_space<vmem>>, %arg6: memref<8x128xf32, #tpu.memory_space<vmem>>) attributes {dimension_semantics = [#tpu.dimension_semantics<parallel>], iteration_bounds = array<i64: 1>, scalar_prefetch = 0 : i64, scratch_operands = 0 : i64, tpu.core_type = #tpu.core_type<tc>, window_params = [{transform_indices = @transform_0, window_bounds = array<i64: 8, 32>}, {pipeline_mode = #tpu.pipeline_mode<synchronous>, transform_indices = @transform_1, window_bounds = array<i64: 3, 32, 32>}, {pipeline_mode = #tpu.pipeline_mode<synchronous>, transform_indices = @transform_2, window_bounds = array<i64: 3, 32>}, {pipeline_mode = #tpu.pipeline_mode<synchronous>, transform_indices = @transform_3, window_bounds = array<i64: 32, 128>}, {pipeline_mode = #tpu.pipeline_mode<synchronous>, transform_indices = @transform_4, window_bounds = array<i64: 1, 128>}, {transform_indices = @transform_5, window_bounds = array<i64: 8, 128>}]} {
    %c0 = arith.constant 0 : index
    %c0_0 = arith.constant 0 : index
    %0 = vector.load %arg1[%c0, %c0_0] : memref<8x32xf32, #tpu.memory_space<vmem>>, vector<8x32xf32>
    %1 = arith.truncf %0 : vector<8x32xf32> to vector<8x32xbf16>
    %c0_1 = arith.constant 0 : index
    %c0_2 = arith.constant 0 : index
    %c0_3 = arith.constant 0 : index
    %2 = vector.load %arg2[%c0_1, %c0_2, %c0_3] : memref<3x32x32xbf16, #tpu.memory_space<vmem>>, vector<1x32x32xbf16>
    %3 = vector.shape_cast %2 : vector<1x32x32xbf16> to vector<32x32xbf16>
    %cst = arith.constant dense<0.000000e+00> : vector<8x32xf32>
    %4 = tpu.matmul %1, %3, %cst {dimension_numbers = #tpu.dot_dimension_numbers<[1], [0], [0], [1], [0, 0, 1, 1], [], []>} : vector<8x32xbf16>, vector<32x32xbf16>, vector<8x32xf32> -> vector<8x32xf32>
    %c0_4 = arith.constant 0 : index
    %c0_5 = arith.constant 0 : index
    %5 = vector.load %arg3[%c0_4, %c0_5] : memref<3x32xf32, #tpu.memory_space<vmem>>, vector<1x32xf32>
    %6 = vector.broadcast %5 : vector<1x32xf32> to vector<8x32xf32>
    %7 = arith.addf %4, %6 : vector<8x32xf32>
    %cst_6 = arith.constant 0.000000e+00 : f32
    %8 = vector.broadcast %cst_6 : f32 to vector<8x32xf32>
    %9 = arith.maximumf %7, %8 : vector<8x32xf32>
    %10 = arith.truncf %9 : vector<8x32xf32> to vector<8x32xbf16>
    %c1 = arith.constant 1 : index
    %c0_7 = arith.constant 0 : index
    %c0_8 = arith.constant 0 : index
    %11 = vector.load %arg2[%c1, %c0_7, %c0_8] : memref<3x32x32xbf16, #tpu.memory_space<vmem>>, vector<1x32x32xbf16>
    %12 = vector.shape_cast %11 : vector<1x32x32xbf16> to vector<32x32xbf16>
    %cst_9 = arith.constant dense<0.000000e+00> : vector<8x32xf32>
    %13 = tpu.matmul %10, %12, %cst_9 {dimension_numbers = #tpu.dot_dimension_numbers<[1], [0], [0], [1], [0, 0, 1, 1], [], []>} : vector<8x32xbf16>, vector<32x32xbf16>, vector<8x32xf32> -> vector<8x32xf32>
    %c1_10 = arith.constant 1 : index
    %c0_11 = arith.constant 0 : index
    %14 = vector.load %arg3[%c1_10, %c0_11] : memref<3x32xf32, #tpu.memory_space<vmem>>, vector<1x32xf32>
    %15 = vector.broadcast %14 : vector<1x32xf32> to vector<8x32xf32>
    %16 = arith.addf %13, %15 : vector<8x32xf32>
    %cst_12 = arith.constant 0.000000e+00 : f32
    %17 = vector.broadcast %cst_12 : f32 to vector<8x32xf32>
    %18 = arith.maximumf %16, %17 : vector<8x32xf32>
    %19 = arith.truncf %18 : vector<8x32xf32> to vector<8x32xbf16>
    %c2 = arith.constant 2 : index
    %c0_13 = arith.constant 0 : index
    %c0_14 = arith.constant 0 : index
    %20 = vector.load %arg2[%c2, %c0_13, %c0_14] : memref<3x32x32xbf16, #tpu.memory_space<vmem>>, vector<1x32x32xbf16>
    %21 = vector.shape_cast %20 : vector<1x32x32xbf16> to vector<32x32xbf16>
    %cst_15 = arith.constant dense<0.000000e+00> : vector<8x32xf32>
    %22 = tpu.matmul %19, %21, %cst_15 {dimension_numbers = #tpu.dot_dimension_numbers<[1], [0], [0], [1], [0, 0, 1, 1], [], []>} : vector<8x32xbf16>, vector<32x32xbf16>, vector<8x32xf32> -> vector<8x32xf32>
    %c2_16 = arith.constant 2 : index
    %c0_17 = arith.constant 0 : index
    %23 = vector.load %arg3[%c2_16, %c0_17] : memref<3x32xf32, #tpu.memory_space<vmem>>, vector<1x32xf32>
    %24 = vector.broadcast %23 : vector<1x32xf32> to vector<8x32xf32>
    %25 = arith.addf %22, %24 : vector<8x32xf32>
    %cst_18 = arith.constant 0.000000e+00 : f32
    %26 = vector.broadcast %cst_18 : f32 to vector<8x32xf32>
    %27 = arith.maximumf %25, %26 : vector<8x32xf32>
    %28 = arith.truncf %27 : vector<8x32xf32> to vector<8x32xbf16>
    %c0_19 = arith.constant 0 : index
    %c0_20 = arith.constant 0 : index
    %29 = vector.load %arg4[%c0_19, %c0_20] : memref<32x128xbf16, #tpu.memory_space<vmem>>, vector<32x128xbf16>
    %cst_21 = arith.constant dense<0.000000e+00> : vector<8x128xf32>
    %30 = tpu.matmul %28, %29, %cst_21 {dimension_numbers = #tpu.dot_dimension_numbers<[1], [0], [0], [1], [0, 0, 1, 1], [], []>} : vector<8x32xbf16>, vector<32x128xbf16>, vector<8x128xf32> -> vector<8x128xf32>
    %c0_22 = arith.constant 0 : index
    %c0_23 = arith.constant 0 : index
    %31 = vector.load %arg5[%c0_22, %c0_23] : memref<1x128xf32, #tpu.memory_space<vmem>>, vector<1x128xf32>
    %32 = vector.broadcast %31 : vector<1x128xf32> to vector<8x128xf32>
    %33 = arith.addf %30, %32 : vector<8x128xf32>
    %c0_24 = arith.constant 0 : index
    %c0_25 = arith.constant 0 : index
    %34 = vector.load %arg6[%c0_24, %c0_25] : memref<8x128xf32, #tpu.memory_space<vmem>>, vector<8x128xf32>
    tpu.vector_store %arg6[%c0_24, %c0_25], %33 {strides = array<i32>} : memref<8x128xf32, #tpu.memory_space<vmem>>, vector<8x128xf32>,
    return
  }
  func.func @transform_0(%arg0: i32) -> (i32, i32) {
    %c0_i32 = arith.constant 0 : i32
    %c0_i32_0 = arith.constant 0 : i32
    return %arg0, %c0_i32 : i32, i32
  }
  func.func @transform_1(%arg0: i32) -> (i32, i32, i32) {
    %c0_i32 = arith.constant 0 : i32
    %c0_i32_0 = arith.constant 0 : i32
    %c0_i32_1 = arith.constant 0 : i32
    %c0_i32_2 = arith.constant 0 : i32
    return %c0_i32, %c0_i32_0, %c0_i32_1 : i32, i32, i32
  }
  func.func @transform_2(%arg0: i32) -> (i32, i32) {
    %c0_i32 = arith.constant 0 : i32
    %c0_i32_0 = arith.constant 0 : i32
    %c0_i32_1 = arith.constant 0 : i32
    return %c0_i32, %c0_i32_0 : i32, i32
  }
  func.func @transform_3(%arg0: i32) -> (i32, i32) {
    %c0_i32 = arith.constant 0 : i32
    %c0_i32_0 = arith.constant 0 : i32
    %c0_i32_1 = arith.constant 0 : i32
    return %c0_i32, %c0_i32_0 : i32, i32
  }
  func.func @transform_4(%arg0: i32) -> (i32, i32) {
    %c0_i32 = arith.constant 0 : i32
    %c0_i32_0 = arith.constant 0 : i32
    %c0_i32_1 = arith.constant 0 : i32
    return %c0_i32, %c0_i32_0 : i32, i32
  }
  func.func @transform_5(%arg0: i32) -> (i32, i32) {
    %c0_i32 = arith.constant 0 : i32
    %c0_i32_0 = arith.constant 0 : i32
    return %arg0, %c0_i32 : i32, i32
  }
}

</mosaic_0001>

<bundles_post_ra>
// kernel: tpu_custom_call.1
= control target key start
LH: loop header
LB: loop body
LE: loop exit
PB: predicated region body
PF: predicated region fallthrough
CT: control target
= control target key end

     0   :  { %10 = vsyncpa [#allocation3], 0  ;;  %s492_s0 = inlined_call_operand.hbm [shape: f32[8,32], index: 0, kind: input, shape index: {}]   ;;  %s493_s1 = inlined_call_operand.hbm [shape: bf16[3,32,32], index: 1, kind: input, shape index: {}]   ;;  %s494_s2 = inlined_call_operand.hbm [shape: f32[3,32], index: 2, kind: input, shape index: {}]   ;;  %s495_s3 = inlined_call_operand.hbm [shape: bf16[32,128], index: 3, kind: input, shape index: {}]   ;;  %s496_s4 = inlined_call_operand.vmem [shape: f32[1,128], index: 4, kind: input, shape index: {}]   ;;  %s497_s5 = inlined_call_operand.hbm [shape: f32[8,128], index: 5, kind: output, shape index: {}]  }
   0x1   :  { %11 = vsyncpa [#allocation6], 0 }
   0x2   :  { %12 = vsyncpa [#allocation9], 0  ;;  %s29_s20 = sshll.u32 %s493_s1, 4  ;;  %s30_s20 = int_to_ptr.hbm [resolvable:$true] %s29_s20 }
   0x3   :  { %13 = vsyncpa [#allocation4], 0  ;;  %s433_s21 = smov [#allocation5]   ;;  %s19_s25 = sshll.u32 %s492_s0, 4  ;;  %s20_s25 = int_to_ptr.hbm [resolvable:$true] %s19_s25 }
   0x4   :  { %s31_s22 = sshll.u32 %s433_s21, 4  ;;  %s434_s26 = smov 64   ;;  %s32_s22 = int_to_ptr.vmem [resolvable:$true] %s31_s22 }
   0x5   :  { %s435_s27 = smov 4   ;;  %s436_s28 = smov [#allocation2]  }
   0x6   :  { %37 = dma.hbm_to_vmem [thread:$0]  %s30_s20, 768, %s32_s22, [#allocation6], %s434_s26, %s434_s26, %s435_s27  }
   0x7   :  { %s21_s29 = sshll.u32 %s436_s28, 4  ;;  %s43_s7 = sshll.u32 %s494_s2, 4  ;;  %s22_s29 = int_to_ptr.vmem [resolvable:$true] %s21_s29  ;;  %s44_s7 = int_to_ptr.hbm [resolvable:$true] %s43_s7 }
   0x8   :  { %24 = dma.hbm_to_vmem [thread:$0]  %s20_s25, 128, %s22_s29, [#allocation3]  }
   0x9   :  { %s53_s9 = sshll.u32 %s495_s3, 4  ;;  %s437_s10 = smov [#allocation7]   ;;  %s54_s9 = int_to_ptr.hbm [resolvable:$true] %s53_s9 }
   0xa   :  { %s45_s11 = sshll.u32 %s437_s10, 4  ;;  %s438_s0 = smov [#allocation8]   ;;  %s46_s11 = int_to_ptr.vmem [resolvable:$true] %s45_s11 }
   0xb   :  { %48 = dma.hbm_to_vmem [thread:$0]  %s44_s7, 64, %s46_s11, [#allocation6]  }
   0xc   :  { %s55_s12 = sshll.u32 %s438_s0, 4  ;;  %s56_s12 = int_to_ptr.vmem [resolvable:$true] %s55_s12 }
   0xd   :  { %61 = dma.hbm_to_vmem [thread:$0]  %s54_s9, 256, %s56_s12, [#allocation9], %s434_s26, %s434_s26, %s435_s27  }
   0xe   :  { %425 = dma.done.wait [#allocation3], 128  }
   0xf   :  { %426 = vsyncadd [#allocation3], 4294967168 }
  0x10   :  { %427 = dma.done.wait [#allocation6], 832  }
  0x11   :  { %428 = vsyncadd [#allocation6], 4294966464 }
  0x12   :  { %429 = dma.done.wait [#allocation9], 256  }
  0x13   :  { %430 = vsyncadd [#allocation9], 4294967040  ;;  %v287_v0 = vld [vmem:[#allocation5 + $0x8] sm:$0xff]  ;;  %v286_v1 = vld [vmem:[#allocation5] sm:$0xff]  ;;  %vm101_vm0 = vcmask 261120   ;;  %s439_s13 = smov [#allocation10]  }
  0x14   :  { %111 = vmatpush.bf16.msra.mxu0 %v287_v0  ;;  %v81_v2 = vld [vmem:[#allocation2] sm:$0xff]  ;;  %v288_v5 = vld [vmem:[#allocation5 + $0x10] sm:$0xff]  ;;  %v291_v12 = vld [vmem:[#allocation5 + $0x28] sm:$0xff]  ;;  %s236_s14 = sshll.u32 %s439_s13, 4  ;;  %s238_s17 = sshll.u32 %s497_s5, 4  ;;  %s237_s14 = int_to_ptr.vmem [resolvable:$true] %s236_s14  ;;  %s239_s17 = int_to_ptr.hbm [resolvable:$true] %s238_s17 }
  0x15   :  { %v82_v3 = vpack.c.bf16 %v81_v2, %v81_v2  ;;  %v289_v4 = vld [vmem:[#allocation5 + $0x18] sm:$0xff]  ;;  %v301_v6 = vld [vmem:[#allocation7] ss:$0 sm:$0xff]  ;;  %185 = vmatpush.bf16.msra.mxu2 %v291_v12  ;;  %v290_v13 = vld [vmem:[#allocation5 + $0x20] sm:$0xff] }
  0x16   :  { %148 = vmatpush.bf16.msra.mxu1 %v289_v4  ;;  %v302_v14 = vld [vmem:[#allocation7 + $0x1] ss:$0 sm:$0xff]  ;;  %v293_v20 = vld [vmem:[#allocation8 + $0x8] sm:$0xff]  ;;  %v292_v21 = vld [vmem:[#allocation8] sm:$0xff] }
  0x17   :  { %223 = vmatpush.bf16.msra.mxu3 %v293_v20  ;;  %v303_v22 = vld [vmem:[#allocation7 + $0x2] ss:$0 sm:$0xff]  ;;  %v304_v28 = vld [vmem:[%s496_s4] ss:$0 sm:$0xff] }
  0x18   :  { %112 = vmatpush.bf16.msra.mxu0 %v286_v1 }
  0x19   :  { %186 = vmatpush.bf16.msra.mxu2 %v290_v13 }
  0x1a   :  { %149 = vmatpush.bf16.msra.mxu1 %v288_v5 }
  0x1b   :  { %258 = vmatmul.msk.bf16.vlgmr.msra.gmra.mxu0 %vm101_vm0, %v82_v3  ;;  %224 = vmatpush.bf16.msra.mxu3 %v292_v21 }
  0x98   :  { %v114_v7 = vpop.f32.mrf.mxu0 }
  0x99   :  { %v115_v8 = vadd.f32 %v301_v6, %v114_v7 }
  0x9b   :  { %v118_v9 = vmax.f32 %v115_v8, 0.0 }
  0x9d   :  { %v119_v10 = vpack.c.bf16 %v118_v9, %v118_v9 }
  0x9f   :  { %267 = vmatmul.msk.bf16.vlgmr.msra.gmra.mxu1 %vm101_vm0, %v119_v10 }
  0xa0   :  { %v116_v11 = vpop.f32.mrf.mxu0 }
 0x11c   :  { %v151_v15 = vpop.f32.mrf.mxu1 }
 0x11d   :  { %v152_v16 = vadd.f32 %v302_v14, %v151_v15 }
 0x11f   :  { %v155_v17 = vmax.f32 %v152_v16, 0.0 }
 0x121   :  { %v156_v18 = vpack.c.bf16 %v155_v17, %v155_v17 }
 0x123   :  { %276 = vmatmul.msk.bf16.vlgmr.msra.gmra.mxu2 %vm101_vm0, %v156_v18 }
 0x124   :  { %v153_v19 = vpop.f32.mrf.mxu1 }
 0x1a6   :  { %v188_v23 = vpop.f32.mrf.mxu2 }
 0x1a7   :  { %v189_v24 = vadd.f32 %v303_v22, %v188_v23 }
 0x1a9   :  { %v192_v25 = vmax.f32 %v189_v24, 0.0 }
 0x1ab   :  { %v193_v26 = vpack.c.bf16 %v192_v25, %v192_v25 }
 0x1ad   :  { %285 = vmatmul.msk.bf16.vlgmr.msra.gmra.mxu3 %vm101_vm0, %v193_v26 }
 0x1ae   :  { %v190_v27 = vpop.f32.mrf.mxu2 }
 0x230   :  { %v226_v29 = vpop.f32.mrf.mxu3 }
 0x231   :  { %v227_v30 = vadd.f32 %v304_v28, %v226_v29 }
 0x233   :  { %230 = vst [vmem:[#allocation10] sm:$0xff] %v227_v30 }
 0x234   :  { %241 = dma.vmem_to_hbm [thread:$0]  %s237_s14, 128, %s239_s17, [#allocation4]  }
 0x238   :  { %v228_v31 = vpop.f32.mrf.mxu3 }
 0x239   :  { %431 = dma.done.wait [#allocation4], 128  }
 0x23a   :  { %432 = vsyncadd [#allocation4], 4294967168 }
 0x23b   :  { %246 = vsyncpa [#allocation3], 1 }
 0x23c   :  { %247 = vsyncpa [#allocation6], 1 }
 0x23d   :  { %248 = vsyncpa [#allocation9], 1 }
 0x23e   :  { %249 = vsyncpa [#allocation4], 1 }

</bundles_post_ra>
